<compile_context>
chip_gen: v6e
topology: v6e:2x2x1
jax: 0.10.0
libtpu: 0.0.40
codegen_flags: <defaults>
</compile_context>

<pallas_src>
import functools

import jax
import jax.numpy as jnp
from jax import lax
from jax.experimental import pallas as pl
from jax.experimental.pallas import tpu as pltpu


def _gather_kernel(ids_ref, w_hbm, out_ref, rows_vmem, sem, *, dma_depth):
    """Gather one (tile_rows, D) tile of embedding rows from the HBM table.

    ids_ref:   (n_rows_padded,) int32 in SMEM (scalar prefetch)
    w_hbm:     (V, D) embedding table left in HBM (memory_space=pl.ANY)
    out_ref:   (tile_rows, D) output tile in VMEM
    rows_vmem: (tile_rows, D) VMEM scratch the row DMAs land in
    sem:       (depth,) DMA semaphores -- ring of in-flight row copies
    """
    tile_rows = out_ref.shape[0]
    base = pl.program_id(0) * tile_rows
    depth = min(dma_depth, tile_rows)

    def start_row(r, row_id):
        pltpu.make_async_copy(
            w_hbm.at[row_id], rows_vmem.at[r], sem.at[r % depth]
        ).start()

    # Prime the pipeline: `depth` row DMAs in flight.
    for r in range(depth):
        start_row(r, ids_ref[base + r])

    def body(r, carry):
        nxt = r + depth
        # Scalar read before the wait (.wait() stalls SMEM load forwarding).
        nxt_id = ids_ref[base + jnp.minimum(nxt, tile_rows - 1)]

        # Wait for row r, then reuse its semaphore slot for row r + depth.
        pltpu.make_async_copy(
            w_hbm.at[0], rows_vmem.at[r], sem.at[r % depth]
        ).wait()

        @pl.when(nxt < tile_rows)
        def _():
            start_row(nxt, nxt_id)

        return carry

    lax.fori_loop(0, tile_rows, body, 0)

    # Single dense (tile_rows, D) store -> unmasked, lane-dense writeback.
    out_ref[...] = rows_vmem[...]


def embedding_lookup(input_ids: jax.Array, weight: jax.Array,
                     *, tile_rows: int = 128, dma_depth: int = 8) -> jax.Array:
    """Pallas equivalent of torch `nn.Embedding(input_ids)` lookup.

    input_ids: [B, S] integer token ids
    weight:    [V, D] embedding table (stays resident in HBM)
    returns:   [B, S, D] embeddings (bit-exact rows of `weight`)
    """
    B, S = input_ids.shape
    V, D = weight.shape
    n_rows = B * S

    n_tiles = pl.cdiv(n_rows, tile_rows)
    n_pad = n_tiles * tile_rows

    ids_flat = input_ids.reshape(n_rows).astype(jnp.int32)
    # torch nn.Embedding raises on out-of-range ids; clamp so the row DMA can
    # never address outside the table (padding rows gather row 0, then get
    # sliced off below).
    ids_flat = jnp.clip(ids_flat, 0, V - 1)
    if n_pad != n_rows:
        ids_flat = jnp.pad(ids_flat, (0, n_pad - n_rows))

    kernel = functools.partial(_gather_kernel, dma_depth=dma_depth)
    depth = min(dma_depth, tile_rows)

    out = pl.pallas_call(
        kernel,
        out_shape=jax.ShapeDtypeStruct((n_pad, D), weight.dtype),
        grid_spec=pltpu.PrefetchScalarGridSpec(
            num_scalar_prefetch=1,
            grid=(n_tiles,),
            in_specs=[
                pl.BlockSpec(memory_space=pl.ANY),        # table stays in HBM
            ],
            out_specs=pl.BlockSpec((tile_rows, D), lambda i, ids: (i, 0)),
            scratch_shapes=[
                pltpu.VMEM((tile_rows, D), weight.dtype),
                pltpu.SemaphoreType.DMA((depth,)),
            ],
        ),
        compiler_params=pltpu.CompilerParams(
            dimension_semantics=("parallel",)),  # row-tile axis shards across TCs
    )(ids_flat, weight)

    return out[:n_rows].reshape(B, S, D)


# TODO(synk): HuggingFace tokenization (string -> token ids) has no Pallas
# equivalent; the kernel consumes already-tokenized integer ids.


if __name__ == "__main__":
    key = jax.random.PRNGKey(0)
    k_w, k_ids = jax.random.split(key)

    # Small synthetic stand-in for BERT's 30522 x 768 table:
    #   vocab V=512, hidden D=128, batch B=2 sequences of length S=8.
    V, D = 512, 128
    B, S = 2, 8

    word_embedding_weight = jax.random.normal(k_w, (V, D), dtype=jnp.float32) * 0.02
    input_ids = jax.random.randint(k_ids, (B, S), 0, V, dtype=jnp.int32)

    # Production-style config (tile_rows=128 pads the 16 rows up to one tile).
    emb = embedding_lookup(input_ids, word_embedding_weight)
    emb = jax.block_until_ready(emb)

    # Also exercise a multi-tile grid + DMA ring on the toy shape.
    emb_tiled = embedding_lookup(input_ids, word_embedding_weight,
                                 tile_rows=8, dma_depth=4)
    emb_tiled = jax.block_until_ready(emb_tiled)

    # Reference: plain JAX gather (same semantics as torch nn.Embedding).
    ref = word_embedding_weight[input_ids]
    assert emb.shape == (B, S, D)
    assert jnp.array_equal(emb, ref), "mismatch vs reference gather"
    assert jnp.array_equal(emb_tiled, ref), "mismatch vs reference gather (tiled)"

    print("KERNEL_OK")
</pallas_src>

<mosaic_0001>
module attributes {stable_mosaic.version = 11 : i64} {
  func.func @_gather_kernel(%arg0: i32, %arg1: memref<128xi32, #tpu.memory_space<smem>>, %arg2: memref<512x128xf32, #tpu.memory_space<any>>, %arg3: memref<128x128xf32, #tpu.memory_space<vmem>>, %arg4: memref<128x128xf32, #tpu.memory_space<vmem>>, %arg5: memref<8x!tpu.dma_semaphore, #tpu.memory_space<semaphore_mem>>) attributes {dimension_semantics = [#tpu.dimension_semantics<parallel>], iteration_bounds = array<i64: 1>, scalar_prefetch = 1 : i64, scratch_operands = 2 : i64, tpu.core_type = #tpu.core_type<tc>, window_params = [{}, {transform_indices = @transform_1, window_bounds = array<i64: 128, 128>}]} {
    %c128_i32 = arith.constant 128 : i32
    %0 = arith.muli %arg0, %c128_i32 : i32
    %c0_i32 = arith.constant 0 : i32
    %1 = arith.addi %0, %c0_i32 : i32
    %2 = arith.index_cast %1 : i32 to index
    %3 = memref.load %arg1[%2] : memref<128xi32, #tpu.memory_space<smem>>
    %c0_i32_0 = arith.constant 0 : i32
    %c0_i32_1 = arith.constant 0 : i32
    %c0_i32_2 = arith.constant 0 : i32
    %4 = tpu.memref_slice %arg2[%3, %c0_i32_2] : memref<512x128xf32, #tpu.memory_space<any>> -> memref<1x128xf32, #tpu.memory_space<any>>
    %5 = tpu.memref_squeeze %4 : memref<1x128xf32, #tpu.memory_space<any>> -> memref<128xf32, #tpu.memory_space<any>>
    %c0_i32_3 = arith.constant 0 : i32
    %6 = tpu.memref_slice %arg4[%c0_i32_0, %c0_i32_3] : memref<128x128xf32, #tpu.memory_space<vmem>> -> memref<1x128xf32, #tpu.memory_space<vmem>>
    %7 = tpu.memref_squeeze %6 : memref<1x128xf32, #tpu.memory_space<vmem>> -> memref<128xf32, #tpu.memory_space<vmem>>
    %8 = tpu.memref_slice %arg5[%c0_i32_1] : memref<8x!tpu.dma_semaphore, #tpu.memory_space<semaphore_mem>> -> memref<1x!tpu.dma_semaphore, #tpu.memory_space<semaphore_mem>>
    %9 = tpu.memref_squeeze %8 : memref<1x!tpu.dma_semaphore, #tpu.memory_space<semaphore_mem>> -> memref<!tpu.dma_semaphore, #tpu.memory_space<semaphore_mem>>
    tpu.enqueue_dma source(%5 : memref<128xf32, #tpu.memory_space<any>>) target(%7 : memref<128xf32, #tpu.memory_space<vmem>>) target_semaphore(%9 : memref<!tpu.dma_semaphore, #tpu.memory_space<semaphore_mem>>)
    %c1_i32 = arith.constant 1 : i32
    %10 = arith.addi %0, %c1_i32 : i32
    %11 = arith.index_cast %10 : i32 to index
    %12 = memref.load %arg1[%11] : memref<128xi32, #tpu.memory_space<smem>>
    %c1_i32_4 = arith.constant 1 : i32
    %c1_i32_5 = arith.constant 1 : i32
    %c0_i32_6 = arith.constant 0 : i32
    %13 = tpu.memref_slice %arg2[%12, %c0_i32_6] : memref<512x128xf32, #tpu.memory_space<any>> -> memref<1x128xf32, #tpu.memory_space<any>>
    %14 = tpu.memref_squeeze %13 : memref<1x128xf32, #tpu.memory_space<any>> -> memref<128xf32, #tpu.memory_space<any>>
    %c0_i32_7 = arith.constant 0 : i32
    %15 = tpu.memref_slice %arg4[%c1_i32_4, %c0_i32_7] : memref<128x128xf32, #tpu.memory_space<vmem>> -> memref<1x128xf32, #tpu.memory_space<vmem>>
    %16 = tpu.memref_squeeze %15 : memref<1x128xf32, #tpu.memory_space<vmem>> -> memref<128xf32, #tpu.memory_space<vmem>>
    %17 = tpu.memref_slice %arg5[%c1_i32_5] : memref<8x!tpu.dma_semaphore, #tpu.memory_space<semaphore_mem>> -> memref<1x!tpu.dma_semaphore, #tpu.memory_space<semaphore_mem>>
    %18 = tpu.memref_squeeze %17 : memref<1x!tpu.dma_semaphore, #tpu.memory_space<semaphore_mem>> -> memref<!tpu.dma_semaphore, #tpu.memory_space<semaphore_mem>>
    tpu.enqueue_dma source(%14 : memref<128xf32, #tpu.memory_space<any>>) target(%16 : memref<128xf32, #tpu.memory_space<vmem>>) target_semaphore(%18 : memref<!tpu.dma_semaphore, #tpu.memory_space<semaphore_mem>>)
    %c2_i32 = arith.constant 2 : i32
    %19 = arith.addi %0, %c2_i32 : i32
    %20 = arith.index_cast %19 : i32 to index
    %21 = memref.load %arg1[%20] : memref<128xi32, #tpu.memory_space<smem>>
    %c2_i32_8 = arith.constant 2 : i32
    %c2_i32_9 = arith.constant 2 : i32
    %c0_i32_10 = arith.constant 0 : i32
    %22 = tpu.memref_slice %arg2[%21, %c0_i32_10] : memref<512x128xf32, #tpu.memory_space<any>> -> memref<1x128xf32, #tpu.memory_space<any>>
    %23 = tpu.memref_squeeze %22 : memref<1x128xf32, #tpu.memory_space<any>> -> memref<128xf32, #tpu.memory_space<any>>
    %c0_i32_11 = arith.constant 0 : i32
    %24 = tpu.memref_slice %arg4[%c2_i32_8, %c0_i32_11] : memref<128x128xf32, #tpu.memory_space<vmem>> -> memref<1x128xf32, #tpu.memory_space<vmem>>
    %25 = tpu.memref_squeeze %24 : memref<1x128xf32, #tpu.memory_space<vmem>> -> memref<128xf32, #tpu.memory_space<vmem>>
    %26 = tpu.memref_slice %arg5[%c2_i32_9] : memref<8x!tpu.dma_semaphore, #tpu.memory_space<semaphore_mem>> -> memref<1x!tpu.dma_semaphore, #tpu.memory_space<semaphore_mem>>
    %27 = tpu.memref_squeeze %26 : memref<1x!tpu.dma_semaphore, #tpu.memory_space<semaphore_mem>> -> memref<!tpu.dma_semaphore, #tpu.memory_space<semaphore_mem>>
    tpu.enqueue_dma source(%23 : memref<128xf32, #tpu.memory_space<any>>) target(%25 : memref<128xf32, #tpu.memory_space<vmem>>) target_semaphore(%27 : memref<!tpu.dma_semaphore, #tpu.memory_space<semaphore_mem>>)
    %c3_i32 = arith.constant 3 : i32
    %28 = arith.addi %0, %c3_i32 : i32
    %29 = arith.index_cast %28 : i32 to index
    %30 = memref.load %arg1[%29] : memref<128xi32, #tpu.memory_space<smem>>
    %c3_i32_12 = arith.constant 3 : i32
    %c3_i32_13 = arith.constant 3 : i32
    %c0_i32_14 = arith.constant 0 : i32
    %31 = tpu.memref_slice %arg2[%30, %c0_i32_14] : memref<512x128xf32, #tpu.memory_space<any>> -> memref<1x128xf32, #tpu.memory_space<any>>
    %32 = tpu.memref_squeeze %31 : memref<1x128xf32, #tpu.memory_space<any>> -> memref<128xf32, #tpu.memory_space<any>>
    %c0_i32_15 = arith.constant 0 : i32
    %33 = tpu.memref_slice %arg4[%c3_i32_12, %c0_i32_15] : memref<128x128xf32, #tpu.memory_space<vmem>> -> memref<1x128xf32, #tpu.memory_space<vmem>>
    %34 = tpu.memref_squeeze %33 : memref<1x128xf32, #tpu.memory_space<vmem>> -> memref<128xf32, #tpu.memory_space<vmem>>
    %35 = tpu.memref_slice %arg5[%c3_i32_13] : memref<8x!tpu.dma_semaphore, #tpu.memory_space<semaphore_mem>> -> memref<1x!tpu.dma_semaphore, #tpu.memory_space<semaphore_mem>>
    %36 = tpu.memref_squeeze %35 : memref<1x!tpu.dma_semaphore, #tpu.memory_space<semaphore_mem>> -> memref<!tpu.dma_semaphore, #tpu.memory_space<semaphore_mem>>
    tpu.enqueue_dma source(%32 : memref<128xf32, #tpu.memory_space<any>>) target(%34 : memref<128xf32, #tpu.memory_space<vmem>>) target_semaphore(%36 : memref<!tpu.dma_semaphore, #tpu.memory_space<semaphore_mem>>)
    %c4_i32 = arith.constant 4 : i32
    %37 = arith.addi %0, %c4_i32 : i32
    %38 = arith.index_cast %37 : i32 to index
    %39 = memref.load %arg1[%38] : memref<128xi32, #tpu.memory_space<smem>>
    %c4_i32_16 = arith.constant 4 : i32
    %c4_i32_17 = arith.constant 4 : i32
    %c0_i32_18 = arith.constant 0 : i32
    %40 = tpu.memref_slice %arg2[%39, %c0_i32_18] : memref<512x128xf32, #tpu.memory_space<any>> -> memref<1x128xf32, #tpu.memory_space<any>>
    %41 = tpu.memref_squeeze %40 : memref<1x128xf32, #tpu.memory_space<any>> -> memref<128xf32, #tpu.memory_space<any>>
    %c0_i32_19 = arith.constant 0 : i32
    %42 = tpu.memref_slice %arg4[%c4_i32_16, %c0_i32_19] : memref<128x128xf32, #tpu.memory_space<vmem>> -> memref<1x128xf32, #tpu.memory_space<vmem>>
    %43 = tpu.memref_squeeze %42 : memref<1x128xf32, #tpu.memory_space<vmem>> -> memref<128xf32, #tpu.memory_space<vmem>>
    %44 = tpu.memref_slice %arg5[%c4_i32_17] : memref<8x!tpu.dma_semaphore, #tpu.memory_space<semaphore_mem>> -> memref<1x!tpu.dma_semaphore, #tpu.memory_space<semaphore_mem>>
    %45 = tpu.memref_squeeze %44 : memref<1x!tpu.dma_semaphore, #tpu.memory_space<semaphore_mem>> -> memref<!tpu.dma_semaphore, #tpu.memory_space<semaphore_mem>>
    tpu.enqueue_dma source(%41 : memref<128xf32, #tpu.memory_space<any>>) target(%43 : memref<128xf32, #tpu.memory_space<vmem>>) target_semaphore(%45 : memref<!tpu.dma_semaphore, #tpu.memory_space<semaphore_mem>>)
    %c5_i32 = arith.constant 5 : i32
    %46 = arith.addi %0, %c5_i32 : i32
    %47 = arith.index_cast %46 : i32 to index
    %48 = memref.load %arg1[%47] : memref<128xi32, #tpu.memory_space<smem>>
    %c5_i32_20 = arith.constant 5 : i32
    %c5_i32_21 = arith.constant 5 : i32
    %c0_i32_22 = arith.constant 0 : i32
    %49 = tpu.memref_slice %arg2[%48, %c0_i32_22] : memref<512x128xf32, #tpu.memory_space<any>> -> memref<1x128xf32, #tpu.memory_space<any>>
    %50 = tpu.memref_squeeze %49 : memref<1x128xf32, #tpu.memory_space<any>> -> memref<128xf32, #tpu.memory_space<any>>
    %c0_i32_23 = arith.constant 0 : i32
    %51 = tpu.memref_slice %arg4[%c5_i32_20, %c0_i32_23] : memref<128x128xf32, #tpu.memory_space<vmem>> -> memref<1x128xf32, #tpu.memory_space<vmem>>
    %52 = tpu.memref_squeeze %51 : memref<1x128xf32, #tpu.memory_space<vmem>> -> memref<128xf32, #tpu.memory_space<vmem>>
    %53 = tpu.memref_slice %arg5[%c5_i32_21] : memref<8x!tpu.dma_semaphore, #tpu.memory_space<semaphore_mem>> -> memref<1x!tpu.dma_semaphore, #tpu.memory_space<semaphore_mem>>
    %54 = tpu.memref_squeeze %53 : memref<1x!tpu.dma_semaphore, #tpu.memory_space<semaphore_mem>> -> memref<!tpu.dma_semaphore, #tpu.memory_space<semaphore_mem>>
    tpu.enqueue_dma source(%50 : memref<128xf32, #tpu.memory_space<any>>) target(%52 : memref<128xf32, #tpu.memory_space<vmem>>) target_semaphore(%54 : memref<!tpu.dma_semaphore, #tpu.memory_space<semaphore_mem>>)
    %c6_i32 = arith.constant 6 : i32
    %55 = arith.addi %0, %c6_i32 : i32
    %56 = arith.index_cast %55 : i32 to index
    %57 = memref.load %arg1[%56] : memref<128xi32, #tpu.memory_space<smem>>
    %c6_i32_24 = arith.constant 6 : i32
    %c6_i32_25 = arith.constant 6 : i32
    %c0_i32_26 = arith.constant 0 : i32
    %58 = tpu.memref_slice %arg2[%57, %c0_i32_26] : memref<512x128xf32, #tpu.memory_space<any>> -> memref<1x128xf32, #tpu.memory_space<any>>
    %59 = tpu.memref_squeeze %58 : memref<1x128xf32, #tpu.memory_space<any>> -> memref<128xf32, #tpu.memory_space<any>>
    %c0_i32_27 = arith.constant 0 : i32
    %60 = tpu.memref_slice %arg4[%c6_i32_24, %c0_i32_27] : memref<128x128xf32, #tpu.memory_space<vmem>> -> memref<1x128xf32, #tpu.memory_space<vmem>>
    %61 = tpu.memref_squeeze %60 : memref<1x128xf32, #tpu.memory_space<vmem>> -> memref<128xf32, #tpu.memory_space<vmem>>
    %62 = tpu.memref_slice %arg5[%c6_i32_25] : memref<8x!tpu.dma_semaphore, #tpu.memory_space<semaphore_mem>> -> memref<1x!tpu.dma_semaphore, #tpu.memory_space<semaphore_mem>>
    %63 = tpu.memref_squeeze %62 : memref<1x!tpu.dma_semaphore, #tpu.memory_space<semaphore_mem>> -> memref<!tpu.dma_semaphore, #tpu.memory_space<semaphore_mem>>
    tpu.enqueue_dma source(%59 : memref<128xf32, #tpu.memory_space<any>>) target(%61 : memref<128xf32, #tpu.memory_space<vmem>>) target_semaphore(%63 : memref<!tpu.dma_semaphore, #tpu.memory_space<semaphore_mem>>)
    %c7_i32 = arith.constant 7 : i32
    %64 = arith.addi %0, %c7_i32 : i32
    %65 = arith.index_cast %64 : i32 to index
    %66 = memref.load %arg1[%65] : memref<128xi32, #tpu.memory_space<smem>>
    %c7_i32_28 = arith.constant 7 : i32
    %c7_i32_29 = arith.constant 7 : i32
    %c0_i32_30 = arith.constant 0 : i32
    %67 = tpu.memref_slice %arg2[%66, %c0_i32_30] : memref<512x128xf32, #tpu.memory_space<any>> -> memref<1x128xf32, #tpu.memory_space<any>>
    %68 = tpu.memref_squeeze %67 : memref<1x128xf32, #tpu.memory_space<any>> -> memref<128xf32, #tpu.memory_space<any>>
    %c0_i32_31 = arith.constant 0 : i32
    %69 = tpu.memref_slice %arg4[%c7_i32_28, %c0_i32_31] : memref<128x128xf32, #tpu.memory_space<vmem>> -> memref<1x128xf32, #tpu.memory_space<vmem>>
    %70 = tpu.memref_squeeze %69 : memref<1x128xf32, #tpu.memory_space<vmem>> -> memref<128xf32, #tpu.memory_space<vmem>>
    %71 = tpu.memref_slice %arg5[%c7_i32_29] : memref<8x!tpu.dma_semaphore, #tpu.memory_space<semaphore_mem>> -> memref<1x!tpu.dma_semaphore, #tpu.memory_space<semaphore_mem>>
    %72 = tpu.memref_squeeze %71 : memref<1x!tpu.dma_semaphore, #tpu.memory_space<semaphore_mem>> -> memref<!tpu.dma_semaphore, #tpu.memory_space<semaphore_mem>>
    tpu.enqueue_dma source(%68 : memref<128xf32, #tpu.memory_space<any>>) target(%70 : memref<128xf32, #tpu.memory_space<vmem>>) target_semaphore(%72 : memref<!tpu.dma_semaphore, #tpu.memory_space<semaphore_mem>>)
    %c0_i32_32 = arith.constant 0 : i32
    %c128_i32_33 = arith.constant 128 : i32
    %73 = arith.addi %c0_i32_32, %c128_i32_33 : i32
    %c1_i32_34 = arith.constant 1 : i32
    scf.for %arg6 = %c0_i32_32 to %73 step %c1_i32_34  : i32 {
      %c8_i32 = arith.constant 8 : i32
      %76 = arith.addi %arg6, %c8_i32 : i32
      %c127_i32 = arith.constant 127 : i32
      %77 = arith.minsi %76, %c127_i32 : i32
      %78 = arith.addi %0, %77 : i32
      %79 = arith.index_cast %78 : i32 to index
      %80 = memref.load %arg1[%79] : memref<128xi32, #tpu.memory_space<smem>>
      %c8_i32_39 = arith.constant 8 : i32
      %c0_i32_40 = arith.constant 0 : i32
      %81 = arith.cmpi eq, %c8_i32_39, %c0_i32_40 : i32
      %c1_i32_41 = arith.constant 1 : i32
      %82 = arith.select %81, %c1_i32_41, %c8_i32_39 : i32
      %83 = arith.remsi %arg6, %82 : i32
      %c0_i32_42 = arith.constant 0 : i32
      %84 = arith.cmpi ne, %83, %c0_i32_42 : i32
      %c0_i32_43 = arith.constant 0 : i32
      %85 = arith.cmpi slt, %83, %c0_i32_43 : i32
      %c0_i32_44 = arith.constant 0 : i32
      %86 = arith.cmpi slt, %82, %c0_i32_44 : i32
      %87 = arith.xori %85, %86 : i1
      %88 = arith.andi %87, %84 : i1
      %89 = arith.addi %83, %82 : i32
      %90 = arith.select %88, %89, %83 : i32
      %c0_i32_45 = arith.constant 0 : i32
      %c0_i32_46 = arith.constant 0 : i32
      %91 = tpu.memref_slice %arg2[%c0_i32_45, %c0_i32_46] : memref<512x128xf32, #tpu.memory_space<any>> -> memref<1x128xf32, #tpu.memory_space<any>>
      %92 = tpu.memref_squeeze %91 : memref<1x128xf32, #tpu.memory_space<any>> -> memref<128xf32, #tpu.memory_space<any>>
      %c0_i32_47 = arith.constant 0 : i32
      %93 = tpu.memref_slice %arg4[%arg6, %c0_i32_47] : memref<128x128xf32, #tpu.memory_space<vmem>> -> memref<1x128xf32, #tpu.memory_space<vmem>>
      %94 = tpu.memref_squeeze %93 : memref<1x128xf32, #tpu.memory_space<vmem>> -> memref<128xf32, #tpu.memory_space<vmem>>
      %95 = tpu.memref_slice %arg5[%90] : memref<8x!tpu.dma_semaphore, #tpu.memory_space<semaphore_mem>> -> memref<1x!tpu.dma_semaphore, #tpu.memory_space<semaphore_mem>>
      %96 = tpu.memref_squeeze %95 : memref<1x!tpu.dma_semaphore, #tpu.memory_space<semaphore_mem>> -> memref<!tpu.dma_semaphore, #tpu.memory_space<semaphore_mem>>
      tpu.wait_dma2 semaphore(%96 : memref<!tpu.dma_semaphore, #tpu.memory_space<semaphore_mem>>) src(%92 : memref<128xf32, #tpu.memory_space<any>>) dst(%94 : memref<128xf32, #tpu.memory_space<vmem>>)
      %c128_i32_48 = arith.constant 128 : i32
      %97 = arith.cmpi slt, %76, %c128_i32_48 : i32
      %98 = arith.extui %97 : i1 to i32
      %c0_i32_49 = arith.constant 0 : i32
      %99 = arith.cmpi ne, %98, %c0_i32_49 : i32
      scf.if %99 {
        %c8_i32_50 = arith.constant 8 : i32
        %c0_i32_51 = arith.constant 0 : i32
        %100 = arith.cmpi eq, %c8_i32_50, %c0_i32_51 : i32
        %c1_i32_52 = arith.constant 1 : i32
        %101 = arith.select %100, %c1_i32_52, %c8_i32_50 : i32
        %102 = arith.remsi %76, %101 : i32
        %c0_i32_53 = arith.constant 0 : i32
        %103 = arith.cmpi ne, %102, %c0_i32_53 : i32
        %c0_i32_54 = arith.constant 0 : i32
        %104 = arith.cmpi slt, %102, %c0_i32_54 : i32
        %c0_i32_55 = arith.constant 0 : i32
        %105 = arith.cmpi slt, %101, %c0_i32_55 : i32
        %106 = arith.xori %104, %105 : i1
        %107 = arith.andi %106, %103 : i1
        %108 = arith.addi %102, %101 : i32
        %109 = arith.select %107, %108, %102 : i32
        %c0_i32_56 = arith.constant 0 : i32
        %110 = tpu.memref_slice %arg2[%80, %c0_i32_56] : memref<512x128xf32, #tpu.memory_space<any>> -> memref<1x128xf32, #tpu.memory_space<any>>
        %111 = tpu.memref_squeeze %110 : memref<1x128xf32, #tpu.memory_space<any>> -> memref<128xf32, #tpu.memory_space<any>>
        %c0_i32_57 = arith.constant 0 : i32
        %112 = tpu.memref_slice %arg4[%76, %c0_i32_57] : memref<128x128xf32, #tpu.memory_space<vmem>> -> memref<1x128xf32, #tpu.memory_space<vmem>>
        %113 = tpu.memref_squeeze %112 : memref<1x128xf32, #tpu.memory_space<vmem>> -> memref<128xf32, #tpu.memory_space<vmem>>
        %114 = tpu.memref_slice %arg5[%109] : memref<8x!tpu.dma_semaphore, #tpu.memory_space<semaphore_mem>> -> memref<1x!tpu.dma_semaphore, #tpu.memory_space<semaphore_mem>>
        %115 = tpu.memref_squeeze %114 : memref<1x!tpu.dma_semaphore, #tpu.memory_space<semaphore_mem>> -> memref<!tpu.dma_semaphore, #tpu.memory_space<semaphore_mem>>
        tpu.enqueue_dma source(%111 : memref<128xf32, #tpu.memory_space<any>>) target(%113 : memref<128xf32, #tpu.memory_space<vmem>>) target_semaphore(%115 : memref<!tpu.dma_semaphore, #tpu.memory_space<semaphore_mem>>)
      } else {
      }
    }
    %c128_i32_35 = arith.constant 128 : i32
    %c0 = arith.constant 0 : index
    %c0_36 = arith.constant 0 : index
    %74 = vector.load %arg4[%c0, %c0_36] : memref<128x128xf32, #tpu.memory_space<vmem>>, vector<128x128xf32>
    %c0_37 = arith.constant 0 : index
    %c0_38 = arith.constant 0 : index
    %75 = vector.load %arg3[%c0_37, %c0_38] : memref<128x128xf32, #tpu.memory_space<vmem>>, vector<128x128xf32>
    tpu.vector_store %arg3[%c0_37, %c0_38], %74 {strides = array<i32>} : memref<128x128xf32, #tpu.memory_space<vmem>>, vector<128x128xf32>,
    return
  }
  func.func @transform_1(%arg0: i32, %arg1: memref<128xi32, #tpu.memory_space<smem>>) -> (i32, i32) {
    %c0_i32 = arith.constant 0 : i32
    %c0_i32_0 = arith.constant 0 : i32
    return %arg0, %c0_i32 : i32, i32
  }
}

</mosaic_0001>

<bundles_post_ra>
// kernel: tpu_custom_call.1
= control target key start
LH: loop header
LB: loop body
LE: loop exit
PB: predicated region body
PF: predicated region fallthrough
CT: control target
= control target key end

     0   :  { %s631_s9 = smov [#allocation5]   ;;  %s822_s0 = inlined_call_operand.hbm [shape: s32[128], index: 0, kind: input, shape index: {}]   ;;  %s823_s1 = inlined_call_operand.hbm [shape: f32[512,128], index: 1, kind: input, shape index: {}]   ;;  %s824_s2 = inlined_call_operand.hbm [shape: f32[128,128], index: 2, kind: output, shape index: {}]  }
   0x1   :  { %8 = dma.hbm_to_smem %s822_s0, 16, %s631_s9, [#allocation4] }
   0x2   :  { %621 = dma.done.wait [#allocation4], 16 }
   0x3   :  { %622 = vsyncadd [#allocation4], 4294967280 }
   0x4   :  { %10 = sfence }
   0x5   :  { %11 = vsyncpa [#allocation7], 0  ;;  %s13_s12 = sld [smem:[#allocation5]]  ;;  %s632_s13 = smov [#allocation2]  }
   0x6   :  { %s23_s14 = sshll.u32 %s632_s13, 4  ;;  %s661_s15 = sld [smem:[#allocation5 + $0x1]]  ;;  %s663_s14 = int_to_ptr.vmem [resolvable:$true] %s23_s14 }
   0x7   :  { %s633_s16 = smov [#allocation2 + $0x1]   ;;  %s665_s18 = sld [smem:[#allocation5 + $0x2]] }
   0x8   :  { %s40_s17 = sshll.u32 %s633_s16, 4  ;;  %s634_s19 = smov [#allocation2 + $0x2]   ;;  %s667_s17 = int_to_ptr.vmem [resolvable:$true] %s40_s17 }
   0x9   :  { %s57_s0 = sshll.u32 %s634_s19, 4  ;;  %s669_s20 = sld [smem:[#allocation5 + $0x3]]  ;;  %s671_s0 = int_to_ptr.vmem [resolvable:$true] %s57_s0 }
   0xa   :  { %s680_s29 = scalar_lea.hbm %s823_s1, 8192 }
   0xb   :  { %s333_s21 = sshll.u32 %s13_s12, 4 }
   0xc   :  { %s15_s24 = scalar_lea.hbm %s823_s1, %s333_s21  ;;  %s335_s25 = sshll.u32 %s661_s15, 4 }
   0xd   :  { %s395_s26 = scalar_lea.hbm %s15_s24, 16  ;;  %p398_p1 = scmp.lt.s32.totalorder %s15_s24, %s823_s1 }
   0xe   :  { %p396_p0 = scmp.ne.s32.totalorder %s15_s24, %s395_s26  ;;  %p399_p2 = scmp.lt.s32.totalorder %s680_s29, %s395_s26 }
  0x10   :  { %p400_p3 = por %p399_p2, %p398_p1 }
  0x12   :  { %p401_p4 = pnand %p400_p3, %p396_p0 }
  0x14   :  { %404 = shalt.err (!%p401_p4)  }
  0x15   :  { %s405_s4 = scalar_lea.vmem %s663_s14, 16  ;;  %s689_s5 = scalar_lea.vmem %s663_s14, 2048 }
  0x16   :  { %p406_p5 = scmp.ne.s32.totalorder %s663_s14, %s405_s4  ;;  %p410_p6 = scmp.lt.s32.totalorder %s663_s14, %s663_s14 }
  0x17   :  { %p411_p7 = scmp.lt.s32.totalorder %s689_s5, %s405_s4 }
  0x19   :  { %p412_p8 = por %p411_p7, %p410_p6 }
  0x1b   :  { %p413_p9 = pnand %p412_p8, %p406_p5 }
  0x1d   :  { %416 = shalt.err (!%p413_p9)  }
  0x1e   :  { %26 = dma.hbm_to_vmem [thread:$0]  %s15_s24, 16, %s663_s14, [#allocation3] }
  0x1f   :  { %s30_s8 = scalar_lea.hbm %s823_s1, %s335_s25  ;;  %s337_s9 = sshll.u32 %s665_s18, 4 }
  0x20   :  { %s417_s10 = scalar_lea.hbm %s30_s8, 16  ;;  %p420_p11 = scmp.lt.s32.totalorder %s30_s8, %s823_s1 }
  0x21   :  { %p418_p10 = scmp.ne.s32.totalorder %s30_s8, %s417_s10  ;;  %p421_p12 = scmp.lt.s32.totalorder %s680_s29, %s417_s10 }
  0x23   :  { %p422_p13 = por %p421_p12, %p420_p11 }
  0x25   :  { %p423_p0 = pnand %p422_p13, %p418_p10 }
  0x27   :  { %426 = shalt.err (!%p423_p0)  }
  0x28   :  { %s427_s13 = scalar_lea.vmem %s667_s17, 16  ;;  %p432_p2 = scmp.lt.s32.totalorder %s667_s17, %s663_s14 }
  0x29   :  { %p428_p1 = scmp.ne.s32.totalorder %s667_s17, %s427_s13  ;;  %p433_p3 = scmp.lt.s32.totalorder %s689_s5, %s427_s13 }
  0x2b   :  { %p434_p4 = por %p433_p3, %p432_p2 }
  0x2d   :  { %p435_p5 = pnand %p434_p4, %p428_p1 }
  0x2f   :  { %438 = shalt.err (!%p435_p5)  }
  0x30   :  { %43 = dma.hbm_to_vmem [thread:$0]  %s30_s8, 16, %s667_s17, [#allocation3 + $0x1] }
  0x31   :  { %s47_s18 = scalar_lea.hbm %s823_s1, %s337_s9  ;;  %s339_s19 = sshll.u32 %s669_s20, 4 }
  0x32   :  { %s439_s21 = scalar_lea.hbm %s47_s18, 16  ;;  %p442_p7 = scmp.lt.s32.totalorder %s47_s18, %s823_s1 }
  0x33   :  { %p440_p6 = scmp.ne.s32.totalorder %s47_s18, %s439_s21  ;;  %p443_p8 = scmp.lt.s32.totalorder %s680_s29, %s439_s21 }
  0x35   :  { %p444_p9 = por %p443_p8, %p442_p7 }
  0x37   :  { %p445_p10 = pnand %p444_p9, %p440_p6 }
  0x39   :  { %448 = shalt.err (!%p445_p10)  }
  0x3a   :  { %s449_s17 = scalar_lea.vmem %s671_s0, 16  ;;  %p454_p12 = scmp.lt.s32.totalorder %s671_s0, %s663_s14 }
  0x3b   :  { %p450_p11 = scmp.ne.s32.totalorder %s671_s0, %s449_s17  ;;  %p455_p13 = scmp.lt.s32.totalorder %s689_s5, %s449_s17 }
  0x3d   :  { %p456_p0 = por %p455_p13, %p454_p12 }
  0x3f   :  { %p457_p1 = pnand %p456_p0, %p450_p11 }
  0x41   :  { %460 = shalt.err (!%p457_p1)  }
  0x42   :  { %60 = dma.hbm_to_vmem [thread:$0]  %s47_s18, 16, %s671_s0, [#allocation3 + $0x2] }
  0x43   :  { %s64_s25 = scalar_lea.hbm %s823_s1, %s339_s19  ;;  %s635_s26 = smov [#allocation2 + $0x3]  }
  0x44   :  { %s74_s27 = sshll.u32 %s635_s26, 4  ;;  %s340_s28 = sld [smem:[#allocation5 + $0x4]]  ;;  %s75_s27 = int_to_ptr.vmem [resolvable:$true] %s74_s27 }
  0x45   :  { %s461_s30 = scalar_lea.hbm %s64_s25, 16  ;;  %p464_p3 = scmp.lt.s32.totalorder %s64_s25, %s823_s1 }
  0x46   :  { %p462_p2 = scmp.ne.s32.totalorder %s64_s25, %s461_s30  ;;  %p465_p4 = scmp.lt.s32.totalorder %s680_s29, %s461_s30 }
  0x48   :  { %p466_p5 = por %p465_p4, %p464_p3 }
  0x4a   :  { %p467_p6 = pnand %p466_p5, %p462_p2 }
  0x4c   :  { %470 = shalt.err (!%p467_p6)  }
  0x4d   :  { %s471_s6 = scalar_lea.vmem %s75_s27, 16  ;;  %p476_p8 = scmp.lt.s32.totalorder %s75_s27, %s663_s14 }
  0x4e   :  { %p472_p7 = scmp.ne.s32.totalorder %s75_s27, %s471_s6  ;;  %p477_p9 = scmp.lt.s32.totalorder %s689_s5, %s471_s6 }
  0x50   :  { %p478_p10 = por %p477_p9, %p476_p8 }
  0x52   :  { %p479_p11 = pnand %p478_p10, %p472_p7 }
  0x54   :  { %482 = shalt.err (!%p479_p11)  }
  0x55   :  { %77 = dma.hbm_to_vmem [thread:$0]  %s64_s25, 16, %s75_s27, [#allocation3 + $0x3] }
  0x56   :  { %s636_s0 = smov [#allocation2 + $0x4]   ;;  %s342_s8 = sld [smem:[#allocation5 + $0x5]] }
  0x57   :  { %s91_s7 = sshll.u32 %s636_s0, 4  ;;  %s637_s9 = smov [#allocation2 + $0x5]   ;;  %s92_s7 = int_to_ptr.vmem [resolvable:$true] %s91_s7 }
  0x58   :  { %s108_s10 = sshll.u32 %s637_s9, 4  ;;  %s732_s11 = sld [smem:[#allocation5 + $0x6]]  ;;  %s734_s10 = int_to_ptr.vmem [resolvable:$true] %s108_s10 }
  0x59   :  { %s341_s12 = sshll.u32 %s340_s28, 4 }
  0x5a   :  { %s81_s16 = scalar_lea.hbm %s823_s1, %s341_s12 }
  0x5b   :  { %s483_s18 = scalar_lea.hbm %s81_s16, 16  ;;  %p486_p13 = scmp.lt.s32.totalorder %s81_s16, %s823_s1 }
  0x5c   :  { %p484_p12 = scmp.ne.s32.totalorder %s81_s16, %s483_s18  ;;  %p487_p0 = scmp.lt.s32.totalorder %s680_s29, %s483_s18 }
  0x5e   :  { %p488_p1 = por %p487_p0, %p486_p13 }
  0x60   :  { %p489_p2 = pnand %p488_p1, %p484_p12 }
  0x62   :  { %492 = shalt.err (!%p489_p2)  }
  0x63   :  { %s493_s22 = scalar_lea.vmem %s92_s7, 16  ;;  %p498_p4 = scmp.lt.s32.totalorder %s92_s7, %s663_s14 }
  0x64   :  { %p494_p3 = scmp.ne.s32.totalorder %s92_s7, %s493_s22  ;;  %p499_p5 = scmp.lt.s32.totalorder %s689_s5, %s493_s22 }
  0x66   :  { %p500_p6 = por %p499_p5, %p498_p4 }
  0x68   :  { %p501_p7 = pnand %p500_p6, %p494_p3 }
  0x6a   :  { %504 = shalt.err (!%p501_p7)  }
  0x6b   :  { %94 = dma.hbm_to_vmem [thread:$0]  %s81_s16, 16, %s92_s7, [#allocation3 + $0x4] }
  0x6c   :  { %s343_s23 = sshll.u32 %s342_s8, 4  ;;  %s638_s17 = smov [#allocation2 + $0x6]  }
  0x6d   :  { %s125_s20 = sshll.u32 %s638_s17, 4  ;;  %s98_s26 = scalar_lea.hbm %s823_s1, %s343_s23  ;;  %s748_s20 = int_to_ptr.vmem [resolvable:$true] %s125_s20 }
  0x6e   :  { %s505_s27 = scalar_lea.hbm %s98_s26, 16  ;;  %p508_p9 = scmp.lt.s32.totalorder %s98_s26, %s823_s1 }
  0x6f   :  { %p506_p8 = scmp.ne.s32.totalorder %s98_s26, %s505_s27  ;;  %p509_p10 = scmp.lt.s32.totalorder %s680_s29, %s505_s27 }
  0x71   :  { %p510_p11 = por %p509_p10, %p508_p9 }
  0x73   :  { %p511_p12 = pnand %p510_p11, %p506_p8 }
  0x75   :  { %514 = shalt.err (!%p511_p12)  }
  0x76   :  { %s515_s3 = scalar_lea.vmem %s734_s10, 16  ;;  %p520_p0 = scmp.lt.s32.totalorder %s734_s10, %s663_s14 }
  0x77   :  { %p516_p13 = scmp.ne.s32.totalorder %s734_s10, %s515_s3  ;;  %p521_p1 = scmp.lt.s32.totalorder %s689_s5, %s515_s3 }
  0x79   :  { %p522_p2 = por %p521_p1, %p520_p0 }
  0x7b   :  { %p523_p3 = pnand %p522_p2, %p516_p13 }
  0x7d   :  { %526 = shalt.err (!%p523_p3)  }
  0x7e   :  { %111 = dma.hbm_to_vmem [thread:$0]  %s98_s26, 16, %s734_s10, [#allocation3 + $0x5] }
  0x7f   :  { %s345_s4 = sshll.u32 %s732_s11, 4  ;;  %s346_s6 = sld [smem:[#allocation5 + $0x7]] }
  0x80   :  { %s115_s8 = scalar_lea.hbm %s823_s1, %s345_s4 }
  0x81   :  { %s527_s9 = scalar_lea.hbm %s115_s8, 16  ;;  %p530_p5 = scmp.lt.s32.totalorder %s115_s8, %s823_s1 }
  0x82   :  { %p528_p4 = scmp.ne.s32.totalorder %s115_s8, %s527_s9  ;;  %p531_p6 = scmp.lt.s32.totalorder %s680_s29, %s527_s9 }
  0x84   :  { %p532_p7 = por %p531_p6, %p530_p5 }
  0x86   :  { %p533_p8 = pnand %p532_p7, %p528_p4 }
  0x88   :  { %536 = shalt.err (!%p533_p8)  }
  0x89   :  { %s537_s10 = scalar_lea.vmem %s748_s20, 16  ;;  %p542_p10 = scmp.lt.s32.totalorder %s748_s20, %s663_s14 }
  0x8a   :  { %p538_p9 = scmp.ne.s32.totalorder %s748_s20, %s537_s10  ;;  %p543_p11 = scmp.lt.s32.totalorder %s689_s5, %s537_s10 }
  0x8c   :  { %p544_p12 = por %p543_p11, %p542_p10 }
  0x8e   :  { %p545_p13 = pnand %p544_p12, %p538_p9 }
  0x90   :  { %548 = shalt.err (!%p545_p13)  }
  0x91   :  { %128 = dma.hbm_to_vmem [thread:$0]  %s115_s8, 16, %s748_s20, [#allocation3 + $0x6] }
  0x92   :  { %s639_s11 = smov [#allocation2 + $0x7]   ;;  %s347_s16 = sshll.u32 %s346_s6, 4 }
  0x93   :  { %s142_s15 = sshll.u32 %s639_s11, 4  ;;  %s132_s21 = scalar_lea.hbm %s823_s1, %s347_s16  ;;  %s143_s15 = int_to_ptr.vmem [resolvable:$true] %s142_s15 }
  0x94   :  { %s549_s22 = scalar_lea.hbm %s132_s21, 16  ;;  %p552_p1 = scmp.lt.s32.totalorder %s132_s21, %s823_s1 }
  0x95   :  { %p550_p0 = scmp.ne.s32.totalorder %s132_s21, %s549_s22  ;;  %p553_p2 = scmp.lt.s32.totalorder %s680_s29, %s549_s22 }
  0x97   :  { %p554_p3 = por %p553_p2, %p552_p1 }
  0x99   :  { %p555_p4 = pnand %p554_p3, %p550_p0 }
  0x9b   :  { %558 = shalt.err (!%p555_p4)  }
  0x9c   :  { %s559_s24 = scalar_lea.vmem %s143_s15, 16  ;;  %p564_p6 = scmp.lt.s32.totalorder %s143_s15, %s663_s14 }
  0x9d   :  { %p560_p5 = scmp.ne.s32.totalorder %s143_s15, %s559_s24  ;;  %p565_p7 = scmp.lt.s32.totalorder %s689_s5, %s559_s24 }
  0x9f   :  { %p566_p8 = por %p565_p7, %p564_p6 }
  0xa1   :  { %p567_p9 = pnand %p566_p8, %p560_p5 }
  0xa3   :  { %570 = shalt.err (!%p567_p9)  }
  0xa4   :  { %145 = dma.hbm_to_vmem [thread:$0]  %s132_s21, 16, %s143_s15, [#allocation3 + $0x7] }
  0xa5   :  { %s783_s20 = smov 0  }
  0xa6 LB: > { %s789_s25 = sadd.s32 8, %s629_s20  ;;  %s158_s26 = ssub.s32 0, %s629_s20  ;;  %s629_s20 = sphi %s783_s20, %s151_s20  }
  0xa7   : > { %p153_p10 = scmp.lt.s32.totalorder %s789_s25, 127  ;;  %p157_p11 = scmp.lt.s32.totalorder %s629_s20, 0 }
  0xa8   : > { %s348_s27 = smin.u32 %s629_s20, %s158_s26 }
  0xa9   : > { %s154_s28 = scalar_select %p153_p10, %s789_s25, 127 }
  0xaa   : > { %s160_s30 = sand.u32 7, %s348_s27  }
  0xab   : > { %s156_s3 = sld [smem:[#allocation5 + %s154_s28]]  ;;  %s161_s4 = ssub.s32 0, %s160_s30 }
  0xac   : > { %s826_s4 = smov (!%p157_p11, %s161_s4), %s160_s30 }
  0xad   : > { %p350_p12 = scmp.lt.s32.totalorder %s826_s4, 0  ;;  %s167_s6 = sadd.s32 8, %s826_s4 }
  0xaf   : > { %s828_s6 = smov (!%p350_p12, %s167_s6), %s826_s4 }
  0xb0   : > { %s169_s0 = scalar_lea.sflag [#allocation3], %s828_s6 }
  0xb1   : > { %623 = dma.done.wait %s169_s0, 16 }
  0xb2   : > { %624 = vsyncadd %s169_s0, 4294967280  ;;  %p176_p13 = scmp.lt.s32.totalorder %s789_s25, 0  ;;  %s177_s7 = ssub.s32 0, %s789_s25 }
  0xb3   : > { %s352_s8 = smin.u32 %s177_s7, %s789_s25  ;;  %s355_s12 = sshll.u32 %s156_s3, 4 }
  0xb4   : > { %s179_s9 = sand.u32 7, %s352_s8   ;;  %p366_p0 = scmp.lt.s32.totalorder %s789_s25, 128 }
  0xb5   : > { %s180_s13 = ssub.s32 0, %s179_s9  ;;  %s325_s10 = scalar_lea.vmem [#allocation2], %s629_s20 }
  0xb6   : > { %s830_s13 = smov (!%p176_p13, %s180_s13), %s179_s9  ;;  %s326_s11 = scalar_lea.vmem %s325_s10, 8 [#allocation2] }
  0xb7   : > { %p354_p1 = scmp.lt.s32.totalorder %s830_s13, 0  ;;  %s186_s15 = sadd.s32 8, %s830_s13 }
  0xb8   : > { %s189_s19 = scalar_lea.hbm %s823_s1, %s355_s12  ;;  %s199_s21 = sshll.u32 %s326_s11, 4  ;;  %s200_s21 = int_to_ptr.vmem [resolvable:$true] %s199_s21 }
  0xb9   : > { %s832_s15 = smov (!%p354_p1, %s186_s15), %s830_s13  ;;  %s571_s23 = scalar_lea.hbm %s189_s19, 16 }
  0xba   : > { %s191_s22 = scalar_lea.sflag [#allocation3], %s832_s15  ;;  %p572_p2 = scmp.ne.s32.totalorder %s189_s19, %s571_s23 }
  0xbb   : > { %p576_p5 = scmp.lt.s32.totalorder %s189_s19, %s823_s1  ;;  %p577_p6 = scmp.lt.s32.totalorder %s680_s29, %s571_s23 }
  0xbc   : > { %p573_p3 = pnand %p572_p2, %p366_p0 }
  0xbd   : > { %p578_p7 = por %p577_p6, %p576_p5 }
  0xbe   : > { %p574_p4 = pneg %p573_p3 }
  0xc0   : > { %p579_p8 = pnand %p578_p7, %p574_p4 }
  0xc2   : > { %582 = shalt.err (!%p579_p8)  }
  0xc3   : > { %s583_s26 = scalar_lea.vmem %s200_s21, 16  ;;  %p590_p12 = scmp.lt.s32.totalorder %s200_s21, %s663_s14 }
  0xc4   : > { %p584_p9 = scmp.ne.s32.totalorder %s200_s21, %s583_s26  ;;  %p591_p13 = scmp.lt.s32.totalorder %s689_s5, %s583_s26 }
  0xc6   : > { %p585_p10 = pnand %p584_p9, %p366_p0  ;;  %p592_p1 = por %p591_p13, %p590_p12 }
  0xc8   : > { %p586_p11 = pneg %p585_p10 }
  0xca   : > { %p593_p2 = pnand %p592_p1, %p586_p11 }
  0xcc   : > { %596 = shalt.err (!%p593_p2)  }
  0xcd   : > { %365 = dma.hbm_to_vmem [thread:$0]  (%p366_p0), %s189_s19, 16, %s200_s21, %s191_s22 }
  0xce   : > { %s151_s20 = sadd.s32 1, %s629_s20  }
  0xcf   : > { %p148_p3 = scmp.ge.s32.totalorder %s151_s20, 128  }
  0xd0   :  { %v203_v0 = vld [vmem:[#allocation2] sm:$0xff] (%p148_p3)  ;;  %v204_v1 = vld [vmem:[#allocation2 + $0x8] sm:$0xff] (%p148_p3)  ;;  %v205_v2 = vld [vmem:[#allocation2 + $0x10] sm:$0xff] (%p148_p3)  ;;  %s640_s27 = smov (%p148_p3), [#allocation6]  }
  0xd1   :  { %150 = sbr.rel (!%p148_p3) target bundleno = 166 (0xa6), region = 100  ;;  %219 = vst [vmem:[#allocation6] sm:$0xff] (%p148_p3), %v203_v0  ;;  %220 = vst [vmem:[#allocation6 + $0x8] sm:$0xff] (%p148_p3), %v204_v1  ;;  %v206_v3 = vld [vmem:[#allocation2 + $0x18] sm:$0xff] (%p148_p3)  ;;  %v207_v4 = vld [vmem:[#allocation2 + $0x20] sm:$0xff] (%p148_p3)  ;;  %s240_s28 = sshll.u32 (%p148_p3), %s640_s27, 4  ;;  %s241_s28 = int_to_ptr.vmem [resolvable:$true] %s240_s28 }
  0xd2   :  { %221 = vst [vmem:[#allocation6 + $0x10] sm:$0xff] (%p148_p3), %v205_v2  ;;  %v208_v5 = vld [vmem:[#allocation2 + $0x28] sm:$0xff] (%p148_p3)  ;;  %222 = vst [vmem:[#allocation6 + $0x18] sm:$0xff] (%p148_p3), %v206_v3  ;;  %v209_v6 = vld [vmem:[#allocation2 + $0x30] sm:$0xff] (%p148_p3)  ;;  %s597_s1 = scalar_lea.vmem (%p148_p3), %s241_s28, 2048  ;;  %p602_p4 = scmp.lt.s32.totalorder (%p148_p3), %s241_s28, %s241_s28 }
  0xd3   :  { %223 = vst [vmem:[#allocation6 + $0x20] sm:$0xff] (%p148_p3), %v207_v4  ;;  %224 = vst [vmem:[#allocation6 + $0x28] sm:$0xff] (%p148_p3), %v208_v5  ;;  %v210_v7 = vld [vmem:[#allocation2 + $0x38] sm:$0xff] (%p148_p3)  ;;  %v211_v8 = vld [vmem:[#allocation2 + $0x40] sm:$0xff] (%p148_p3)  ;;  %p598_p0 = scmp.ne.s32.totalorder (%p148_p3), %s241_s28, %s597_s1  ;;  %p603_p5 = scmp.lt.s32.totalorder (%p148_p3), %s597_s1, %s597_s1 }
  0xd4   :  { %225 = vst [vmem:[#allocation6 + $0x30] sm:$0xff] (%p148_p3), %v209_v6  ;;  %226 = vst [vmem:[#allocation6 + $0x38] sm:$0xff] (%p148_p3), %v210_v7  ;;  %v212_v9 = vld [vmem:[#allocation2 + $0x48] sm:$0xff] (%p148_p3)  ;;  %v213_v10 = vld [vmem:[#allocation2 + $0x50] sm:$0xff] (%p148_p3) }
  0xd5   :  { %227 = vst [vmem:[#allocation6 + $0x40] sm:$0xff] (%p148_p3), %v211_v8  ;;  %v214_v11 = vld [vmem:[#allocation2 + $0x58] sm:$0xff] (%p148_p3)  ;;  %228 = vst [vmem:[#allocation6 + $0x48] sm:$0xff] (%p148_p3), %v212_v9  ;;  %v215_v12 = vld [vmem:[#allocation2 + $0x60] sm:$0xff] (%p148_p3)  ;;  %p604_p6 = por (%p148_p3), %p603_p5, %p602_p4 }
  0xd6   :  { %229 = vst [vmem:[#allocation6 + $0x50] sm:$0xff] %v213_v10  ;;  %230 = vst [vmem:[#allocation6 + $0x58] sm:$0xff] %v214_v11  ;;  %v216_v13 = vld [vmem:[#allocation2 + $0x68] sm:$0xff]  ;;  %v217_v14 = vld [vmem:[#allocation2 + $0x70] sm:$0xff] }
  0xd7   :  { %231 = vst [vmem:[#allocation6 + $0x60] sm:$0xff] %v215_v12  ;;  %232 = vst [vmem:[#allocation6 + $0x68] sm:$0xff] %v216_v13  ;;  %v218_v15 = vld [vmem:[#allocation2 + $0x78] sm:$0xff]  ;;  %p605_p7 = pnand %p604_p6, %p598_p0 }
  0xd8   :  { %233 = vst [vmem:[#allocation6 + $0x70] sm:$0xff] %v217_v14  ;;  %234 = vst [vmem:[#allocation6 + $0x78] sm:$0xff] %v218_v15 }
  0xd9   :  { %608 = shalt.err (!%p605_p7)
}
  0xda   :  { %s641_s14 = smov 128   ;;  %s642_s29 = smov 8  }
  0xdb   :  { %246 = dma.vmem_to_hbm [thread:$0]  %s241_s28, 2048, %s824_s2, [#allocation7], %s641_s14, %s641_s14, %s642_s29  }
  0xdc   :  { %625 = dma.done.wait [#allocation7], 2048  }
  0xdd   :  { %626 = vsyncadd [#allocation7], 4294965248 }
  0xde   :  { %250 = vsyncpa [#allocation7], 1 }
  0xdf   :  { %251 = vsyncmov [#allocation3] }
  0xe2   :  { %s252_s25 = vpop.sfrf %251 }
  0xe3   :  { %p356_p8 = scmp.ne.s32.totalorder %s252_s25, 0 }
  0xe5   :  { %256 = shalt.err (%p356_p8)  }
  0xe6   :  { %258 = vsyncmov [#allocation3 + $0x1] }
  0xe9   :  { %s259_s30 = vpop.sfrf %258 }
  0xea   :  { %p357_p9 = scmp.ne.s32.totalorder %s259_s30, 0 }
  0xec   :  { %263 = shalt.err (%p357_p9)  }
  0xed   :  { %265 = vsyncmov [#allocation3 + $0x2] }
  0xf0   :  { %s266_s3 = vpop.sfrf %265 }
  0xf1   :  { %p358_p10 = scmp.ne.s32.totalorder %s266_s3, 0 }
  0xf3   :  { %270 = shalt.err (%p358_p10)  }
  0xf4   :  { %272 = vsyncmov [#allocation3 + $0x3] }
  0xf7   :  { %s273_s4 = vpop.sfrf %272 }
  0xf8   :  { %p359_p11 = scmp.ne.s32.totalorder %s273_s4, 0 }
  0xfa   :  { %277 = shalt.err (%p359_p11)  }
  0xfb   :  { %279 = vsyncmov [#allocation3 + $0x4] }
  0xfe   :  { %s280_s2 = vpop.sfrf %279 }
  0xff   :  { %p360_p12 = scmp.ne.s32.totalorder %s280_s2, 0 }
 0x101   :  { %284 = shalt.err (%p360_p12)  }
 0x102   :  { %286 = vsyncmov [#allocation3 + $0x5] }
 0x105   :  { %s287_s6 = vpop.sfrf %286 }
 0x106   :  { %p361_p13 = scmp.ne.s32.totalorder %s287_s6, 0 }
 0x108   :  { %291 = shalt.err (%p361_p13)  }
 0x109   :  { %293 = vsyncmov [#allocation3 + $0x6] }
 0x10c   :  { %s294_s0 = vpop.sfrf %293 }
 0x10d   :  { %p362_p1 = scmp.ne.s32.totalorder %s294_s0, 0 }
 0x10f   :  { %298 = shalt.err (%p362_p1)  }
 0x110   :  { %300 = vsyncmov [#allocation3 + $0x7] }
 0x113   :  { %s301_s7 = vpop.sfrf %300 }
 0x114   :  { %p363_p2 = scmp.ne.s32.totalorder %s301_s7, 0 }
 0x116   :  { %305 = shalt.err (%p363_p2)  }

</bundles_post_ra>
